<compile_context>
chip_gen: v6e
topology: v6e:2x2x1
jax: 0.10.0
libtpu: 0.0.40
codegen_flags: <defaults>
</compile_context>

<pallas_src>
import jax
import jax.numpy as jnp
from jax import lax
from jax.experimental import pallas as pl
from jax.experimental.pallas import tpu as pltpu


# ----------------------------------------------------------------------------
# Hardware-aware sizing helpers
# ----------------------------------------------------------------------------
def _vmem_budget_and_limit():
    """Generation-aware VMEM sizing (v5e/v6e: 128 MiB, v7x: 64 MiB physical)."""
    try:
        cap = int(pltpu.get_tpu_info().vmem_capacity_bytes)
        cap = max(cap, 32 << 20)
    except Exception:
        cap = 64 << 20                       # conservative: safe on every gen
    budget = min((cap * 5) // 8, 96 << 20)   # bytes we plan tiles against
    limit = min(budget + (16 << 20), cap - (8 << 20))
    return budget, max(limit, budget)


def _round_down(x, mult):
    return (x // mult) * mult


def _plan_2d(a, m, itemsize, budget, block_agents, block_items):
    # Agent tile: full A when the (A, A) f32 accumulator fits comfortably,
    # otherwise 512-row agent tiles (agent axes then get their own grid dims).
    if block_agents is not None and block_agents < a:
        ta = max(8, _round_down(block_agents, 8))
    elif a * a * 4 <= budget // 3:
        ta = a
    else:
        ta = 512
    ta = min(ta, a)
    tiled = ta < a

    # Item tile: target ~2 MiB per (ta, tm) input block (HBM-bound path),
    # capped by the VMEM budget left after the accumulators.
    n_blocks = 6 if tiled else 4             # inputs x double buffering
    acc_bytes = ta * ta * 4 + ta * 4
    avail = max(budget - acc_bytes, 2 << 20)
    row_bytes = max(ta, 8) * itemsize
    if block_items is not None:
        tm = block_items
    else:
        tm_cap = _round_down(avail // (n_blocks * row_bytes), 128)
        tm_tgt = _round_down((2 << 20) // row_bytes, 128)
        tm = max(128, min(tm_cap, tm_tgt))
    if tm >= m:
        tm = m                               # full item axis -> single k step
    return ta, tm, tiled


def _plan_3d(b, a, m, itemsize, budget, block_batch):
    if block_batch is not None:
        return max(1, min(block_batch, b))
    a_pad = -(-a // 8) * 8                   # sublane padding of a block row
    m_pad = -(-m // 128) * 128               # lane padding of a block row
    blk = a_pad * m_pad * itemsize
    # 2 inputs x 2 buffers + 2 masked scratch copies + ~3 live f32 slabs + acc.
    per_tb = 6 * blk + 3 * a_pad * m_pad * 4 + m_pad * 4
    # TODO(synk): if one (A, M) sample alone exceeds the budget, the agent axis
    # of the 3-D path would also need tiling; not done here.
    return max(1, min(b, budget // per_tb))


# ----------------------------------------------------------------------------
# 2-D kernels  (A agents, M items)
# ----------------------------------------------------------------------------
def _make_ef2d_kernel(a, m, tm):
    """Single agent tile: full (A, A) f32 accumulator, grid over item tiles."""

    def kernel(out_ref, val_ref, o_ref, s_acc):
        k = pl.program_id(0)

        @pl.when(k == 0)
        def _():
            s_acc[...] = jnp.zeros_like(s_acc)

        out = out_ref[...]
        val = val_ref[...]
        if m % tm != 0:                      # ragged last item tile: mask in-kernel
            rem = m - k * tm
            keep = lax.broadcasted_iota(jnp.int32, (a, tm), 1) < rem
            zero = jnp.zeros((), out.dtype)
            out = jnp.where(keep, out, zero)
            val = jnp.where(keep, val, zero)

        # S[i, j] += sum_m out[i, m] * val[j, m]   (MXU, f32 accumulation)
        s_acc[...] += lax.dot_general(
            out, val, (((1,), (1,)), ((), ())),
            preferred_element_type=jnp.float32)

        @pl.when(k == pl.num_programs(0) - 1)
        def _():
            s = s_acc[...]
            rows = lax.broadcasted_iota(jnp.int32, (a, a), 0)
            cols = lax.broadcasted_iota(jnp.int32, (a, a), 1)
            # u[j] = S[j, j]: agent j's utility for its own bundle.
            diag = jnp.sum(jnp.where(rows == cols, s, 0.0), axis=0, keepdims=True)
            o_ref[...] = jnp.sum(jnp.maximum(s - diag, 0.0)).reshape(1, 1)

    return kernel


def _make_ef2d_tiled_kernel(a, m, ta, tm):
    """Agent-tiled variant for large A: (TA, TA) accumulator per (i, j) tile."""

    def kernel(out_i_ref, val_j_ref, out_j_ref, o_ref, s_acc, u_acc):
        i = pl.program_id(0)
        j = pl.program_id(1)
        k = pl.program_id(2)

        @pl.when((i == 0) & (j == 0) & (k == 0))
        def _():
            o_ref[...] = jnp.zeros_like(o_ref)

        @pl.when(k == 0)
        def _():
            s_acc[...] = jnp.zeros_like(s_acc)
            u_acc[...] = jnp.zeros_like(u_acc)

        oi = out_i_ref[...]
        vj = val_j_ref[...]
        oj = out_j_ref[...]
        if m % tm != 0:                      # ragged last item tile
            rem = m - k * tm
            keep = lax.broadcasted_iota(jnp.int32, (ta, tm), 1) < rem
            zero = jnp.zeros((), oi.dtype)
            oi = jnp.where(keep, oi, zero)
            vj = jnp.where(keep, vj, zero)
            oj = jnp.where(keep, oj, zero)

        s_acc[...] += lax.dot_general(
            oi, vj, (((1,), (1,)), ((), ())),
            preferred_element_type=jnp.float32)
        # u[j] = sum_m val[j, m] * out[j, m] as a (1, TA) row, via the idle MXU
        # (avoids a transpose/relayout in the epilogue).
        ones_row = jnp.ones((1, tm), dtype=vj.dtype)
        u_acc[...] += lax.dot_general(
            ones_row, vj * oj, (((1,), (1,)), ((), ())),
            preferred_element_type=jnp.float32)

        @pl.when(k == pl.num_programs(2) - 1)
        def _():
            envy = jnp.maximum(s_acc[...] - u_acc[...], 0.0)
            if a % ta != 0:                  # drop padded agent rows/cols
                rows = lax.broadcasted_iota(jnp.int32, (ta, ta), 0) + i * ta
                cols = lax.broadcasted_iota(jnp.int32, (ta, ta), 1) + j * ta
                envy = jnp.where((rows < a) & (cols < a), envy, 0.0)
            o_ref[...] += jnp.sum(envy).reshape(1, 1)

    return kernel


# ----------------------------------------------------------------------------
# 3-D kernel  (B, A, M): per-item envy, mean over the batch.
# ----------------------------------------------------------------------------
def _make_ef3d_kernel(a, m, tb, b_total, ns, need_bmask, unroll):
    # TODO(synk): for M << 128 a lane-dense relayout (folding (A, M) or the
    # batch into the lane axis) would recover up to 128/M of VPU throughput;
    # not done here to avoid an extra HBM transpose copy in the wrapper.
    def kernel(out_ref, val_ref, o_ref, acc_ref, *mask_scratch):
        c = pl.program_id(0)                 # parallel (megacore) axis
        s = pl.program_id(1)                 # serial batch-tile axis

        @pl.when(s == 0)
        def _():
            acc_ref[...] = jnp.zeros_like(acc_ref)

        out = out_ref[...]
        if need_bmask:
            # Ragged / duplicated batch tiles: zero the padded batch rows so
            # undefined (possibly NaN) VMEM contents never reach the sum.
            outm_ref, valm_ref = mask_scratch
            rem = b_total - (c * ns + s) * tb
            keep = lax.broadcasted_iota(jnp.int32, (tb, a, m), 0) < rem
            zero = jnp.zeros((), out.dtype)
            out = jnp.where(keep, out, zero)
            outm_ref[...] = out
            valm_ref[...] = jnp.where(keep, val_ref[...], zero)
            o_src, v_src = outm_ref, valm_ref
        else:
            o_src, v_src = out_ref, val_ref

        def body(j, carry):
            v_j = v_src[:, pl.ds(j, 1), :]   # (tb, 1, m)
            o_j = o_src[:, pl.ds(j, 1), :]   # (tb, 1, m)
            # d[b, i, m] = val[b,j,m]*out[b,i,m] - val[b,j,m]*out[b,j,m]
            d = v_j * out - v_j * o_j        # (tb, a, m) broadcast, bounded live set
            r = jnp.maximum(d, 0).astype(jnp.float32)
            acc_ref[...] += jnp.sum(r, axis=1)   # lane-shaped partial (tb, m)
            return carry

        lax.fori_loop(0, a, body, 0, unroll=unroll)

        @pl.when(s == pl.num_programs(1) - 1)
        def _():
            # Single cross-lane/sublane reduction per core, per grid sweep.
            o_ref[...] = jnp.full((1, 8, 128), jnp.sum(acc_ref[...]), jnp.float32)

    return kernel


# ----------------------------------------------------------------------------
# Wrapper
# ----------------------------------------------------------------------------
def ef_violation(outputs, labels, valuations, *,
                 block_agents=None, block_items=None, block_batch=None):
    """JAX/Pallas equivalent of EFViolation.forward (labels only shape-checked)."""
    assert valuations is not None, "valuations must not be empty"
    assert outputs.ndim == labels.ndim
    assert outputs.shape == labels.shape

    # bf16 stays bf16 (VPU/MXU-native, f32 accumulation); everything else f32.
    def _prep(x):
        return x if x.dtype == jnp.bfloat16 else x.astype(jnp.float32)

    outputs = _prep(outputs)
    valuations = _prep(valuations)
    if outputs.dtype != valuations.dtype:
        outputs = outputs.astype(jnp.float32)
        valuations = valuations.astype(jnp.float32)

    budget, vmem_limit = _vmem_budget_and_limit()
    itemsize = outputs.dtype.itemsize

    if outputs.ndim == 2:
        a, m = outputs.shape
        ta, tm, tiled = _plan_2d(a, m, itemsize, budget, block_agents, block_items)
        nk = pl.cdiv(m, tm)
        if not tiled:
            res = pl.pallas_call(
                _make_ef2d_kernel(a, m, tm),
                out_shape=jax.ShapeDtypeStruct((1, 1), jnp.float32),
                grid=(nk,),
                in_specs=[pl.BlockSpec((a, tm), lambda k: (0, k)),
                          pl.BlockSpec((a, tm), lambda k: (0, k))],
                out_specs=pl.BlockSpec((1, 1), lambda k: (0, 0)),
                scratch_shapes=[pltpu.VMEM((a, a), jnp.float32)],
                compiler_params=pltpu.CompilerParams(
                    dimension_semantics=("arbitrary",),
                    vmem_limit_bytes=vmem_limit),
            )(outputs, valuations)
        else:
            ni = pl.cdiv(a, ta)
            res = pl.pallas_call(
                _make_ef2d_tiled_kernel(a, m, ta, tm),
                out_shape=jax.ShapeDtypeStruct((1, 1), jnp.float32),
                grid=(ni, ni, nk),
                in_specs=[pl.BlockSpec((ta, tm), lambda i, j, k: (i, k)),
                          pl.BlockSpec((ta, tm), lambda i, j, k: (j, k)),
                          pl.BlockSpec((ta, tm), lambda i, j, k: (j, k))],
                out_specs=pl.BlockSpec((1, 1), lambda i, j, k: (0, 0)),
                scratch_shapes=[pltpu.VMEM((ta, ta), jnp.float32),
                                pltpu.VMEM((1, ta), jnp.float32)],
                compiler_params=pltpu.CompilerParams(
                    dimension_semantics=("arbitrary",) * 3,
                    vmem_limit_bytes=vmem_limit),
            )(outputs, valuations, outputs)
        return res[0, 0]

    elif outputs.ndim == 3:
        b, a, m = outputs.shape
        tb = _plan_3d(b, a, m, itemsize, budget, block_batch)
        ncores = 2                           # v7x megacore; harmless (serial) on v5e/v6e
        nb = pl.cdiv(b, tb)
        ns = pl.cdiv(nb, ncores)
        need_bmask = (ncores * ns * tb) != b
        unroll = a <= 8

        # Overhang tiles are clamped for the DMA and fully masked in-kernel.
        in_map = lambda c, s: (jnp.minimum(c * ns + s, nb - 1), 0, 0)
        scratch_shapes = [pltpu.VMEM((tb, m), jnp.float32)]
        if need_bmask:
            scratch_shapes += [pltpu.VMEM((tb, a, m), outputs.dtype),
                               pltpu.VMEM((tb, a, m), outputs.dtype)]

        partials = pl.pallas_call(
            _make_ef3d_kernel(a, m, tb, b, ns, need_bmask, unroll),
            out_shape=jax.ShapeDtypeStruct((ncores, 8, 128), jnp.float32),
            grid=(ncores, ns),
            in_specs=[pl.BlockSpec((tb, a, m), in_map),
                      pl.BlockSpec((tb, a, m), in_map)],
            out_specs=pl.BlockSpec((1, 8, 128), lambda c, s: (c, 0, 0)),
            scratch_shapes=scratch_shapes,
            compiler_params=pltpu.CompilerParams(
                dimension_semantics=("parallel", "arbitrary"),
                vmem_limit_bytes=vmem_limit),
        )(outputs, valuations)
        # Per-core partial sums; the 1/B mean is applied in the wrapper (needed
        # once the leading grid axis is parallel across TensorCores).
        return partials[:, 0, 0].sum() / b

    else:
        raise ValueError(f"unsupported ndim={outputs.ndim}")


# ----------------------------------------------------------------------------
# Pure-JAX reference
# ----------------------------------------------------------------------------
def ef_violation_ref(outputs, labels, valuations):
    del labels
    outputs = outputs.astype(jnp.float32)
    valuations = valuations.astype(jnp.float32)
    if outputs.ndim == 2:
        s = (valuations * outputs[:, None, :]).sum(axis=2, keepdims=True)
        u = (valuations * outputs).sum(axis=1, keepdims=True)
        return jax.nn.relu(s - u).sum()
    else:
        d = (valuations[:, None, :, :] * outputs[:, :, None, :]
             - (valuations * outputs)[:, None, :, :])
        return jax.nn.relu(d).sum(axis=(3, 2, 1)).mean()


# ----------------------------------------------------------------------------
# Main
# ----------------------------------------------------------------------------
if __name__ == "__main__":
    key = jax.random.PRNGKey(0)
    keys = jax.random.split(key, 10)

    def check(out, ref, rtol=1e-5, atol=1e-5, name=""):
        out = jax.block_until_ready(out)
        assert jnp.allclose(out, ref, rtol=rtol, atol=atol), (name, out, ref)

    # Batched (3-D) case: (B, n_agents, n_items)
    B, A, M = 2, 4, 16
    out3 = jax.nn.softmax(jax.random.normal(keys[0], (B, A, M)), axis=1)
    lbl3 = jnp.zeros_like(out3)
    val3 = jax.nn.relu(jax.random.normal(keys[1], (B, A, M))) + 0.1
    check(ef_violation(out3, lbl3, val3), ef_violation_ref(out3, lbl3, val3), name="3d")

    # Unbatched (2-D) case: (n_agents, n_items)
    out2 = jax.nn.softmax(jax.random.normal(keys[2], (A, M)), axis=0)
    lbl2 = jnp.zeros_like(out2)
    val2 = jax.nn.relu(jax.random.normal(keys[3], (A, M))) + 0.1
    check(ef_violation(out2, lbl2, val2), ef_violation_ref(out2, lbl2, val2), name="2d")

    # 3-D: ragged batch tiling + clamped overhang tiles (forced tb=2, B=5).
    out3b = jax.nn.softmax(jax.random.normal(keys[4], (5, A, M)), axis=1)
    val3b = jax.nn.relu(jax.random.normal(keys[5], (5, A, M))) + 0.1
    lbl3b = jnp.zeros_like(out3b)
    check(ef_violation(out3b, lbl3b, val3b, block_batch=2),
          ef_violation_ref(out3b, lbl3b, val3b), name="3d-ragged")

    # 3-D: exact coverage (no in-kernel batch mask variant; B=8, tb=2).
    out3c = jax.nn.softmax(jax.random.normal(keys[6], (8, A, M)), axis=1)
    val3c = jax.nn.relu(jax.random.normal(keys[7], (8, A, M))) + 0.1
    lbl3c = jnp.zeros_like(out3c)
    check(ef_violation(out3c, lbl3c, val3c, block_batch=2),
          ef_violation_ref(out3c, lbl3c, val3c), name="3d-exact")

    # 2-D: agent- and item-tiled path with ragged tiles (A=12, M=200).
    out2b = jax.nn.softmax(jax.random.normal(keys[8], (12, 200)), axis=0)
    val2b = jax.nn.relu(jax.random.normal(keys[9], (12, 200))) + 0.1
    lbl2b = jnp.zeros_like(out2b)
    check(ef_violation(out2b, lbl2b, val2b, block_agents=8, block_items=128),
          ef_violation_ref(out2b, lbl2b, val2b), rtol=1e-4, atol=1e-4, name="2d-tiled")

    # 2-D: single agent tile but a ragged item tile (exercises the m-mask).
    check(ef_violation(out2b, lbl2b, val2b, block_items=128),
          ef_violation_ref(out2b, lbl2b, val2b), rtol=1e-4, atol=1e-4, name="2d-ragged-m")

    # bf16 inputs stay bf16 on the VPU/MXU (f32 accumulation) -> looser tol.
    check(ef_violation(out3.astype(jnp.bfloat16), lbl3.astype(jnp.bfloat16),
                       val3.astype(jnp.bfloat16)),
          ef_violation_ref(out3.astype(jnp.bfloat16), lbl3, val3.astype(jnp.bfloat16)),
          rtol=3e-2, atol=3e-2, name="3d-bf16")
    check(ef_violation(out2.astype(jnp.bfloat16), lbl2.astype(jnp.bfloat16),
                       val2.astype(jnp.bfloat16)),
          ef_violation_ref(out2.astype(jnp.bfloat16), lbl2, val2.astype(jnp.bfloat16)),
          rtol=3e-2, atol=3e-2, name="2d-bf16")

    print("KERNEL_OK")
</pallas_src>

<mosaic_0001>
module attributes {stable_mosaic.version = 11 : i64} {
  func.func @kernel(%arg0: i32, %arg1: i32, %arg2: memref<2x4x16xf32, #tpu.memory_space<vmem>>, %arg3: memref<2x4x16xf32, #tpu.memory_space<vmem>>, %arg4: memref<1x8x128xf32, #tpu.memory_space<vmem>>, %arg5: memref<2x16xf32, #tpu.memory_space<vmem>>, %arg6: memref<2x4x16xf32, #tpu.memory_space<vmem>>, %arg7: memref<2x4x16xf32, #tpu.memory_space<vmem>>) attributes {dimension_semantics = [#tpu.dimension_semantics<parallel>, #tpu.dimension_semantics<arbitrary>], iteration_bounds = array<i64: 2, 1>, scalar_prefetch = 0 : i64, scratch_operands = 3 : i64, tpu.core_type = #tpu.core_type<tc>, window_params = [{transform_indices = @transform_0, window_bounds = array<i64: 2, 4, 16>}, {transform_indices = @transform_1, window_bounds = array<i64: 2, 4, 16>}, {transform_indices = @transform_2, window_bounds = array<i64: 1, 8, 128>}]} {
    %c0_i32 = arith.constant 0 : i32
    %0 = arith.cmpi eq, %arg1, %c0_i32 : i32
    %1 = arith.extui %0 : i1 to i32
    %c0_i32_0 = arith.constant 0 : i32
    %2 = arith.cmpi ne, %1, %c0_i32_0 : i32
    scf.if %2 {
      %cst_59 = arith.constant 0.000000e+00 : f32
      %81 = vector.broadcast %cst_59 : f32 to vector<2x16xf32>
      %c0_60 = arith.constant 0 : index
      %c0_61 = arith.constant 0 : index
      %82 = vector.load %arg5[%c0_60, %c0_61] : memref<2x16xf32, #tpu.memory_space<vmem>>, vector<2x16xf32>
      tpu.vector_store %arg5[%c0_60, %c0_61], %81 {strides = array<i32>} : memref<2x16xf32, #tpu.memory_space<vmem>>, vector<2x16xf32>,
    } else {
    }
    %c0 = arith.constant 0 : index
    %c0_1 = arith.constant 0 : index
    %c0_2 = arith.constant 0 : index
    %3 = vector.load %arg2[%c0, %c0_1, %c0_2] : memref<2x4x16xf32, #tpu.memory_space<vmem>>, vector<2x4x16xf32>
    %c1_i32 = arith.constant 1 : i32
    %4 = arith.muli %arg0, %c1_i32 : i32
    %5 = arith.addi %4, %arg1 : i32
    %c2_i32 = arith.constant 2 : i32
    %6 = arith.muli %5, %c2_i32 : i32
    %c2_i32_3 = arith.constant 2 : i32
    %7 = arith.subi %c2_i32_3, %6 : i32
    %8 = tpu.iota {dimensions = array<i32: 0>} : vector<2x4x16xi32>
    %9 = vector.broadcast %7 : i32 to vector<2x4x16xi32>
    %10 = arith.cmpi slt, %8, %9 : vector<2x4x16xi32>
    %cst = arith.constant 0.000000e+00 : f32
    %11 = vector.broadcast %cst : f32 to vector<2x4x16xf32>
    %12 = arith.select %10, %3, %11 : vector<2x4x16xi1>, vector<2x4x16xf32>
    %c0_4 = arith.constant 0 : index
    %c0_5 = arith.constant 0 : index
    %c0_6 = arith.constant 0 : index
    %13 = vector.load %arg6[%c0_4, %c0_5, %c0_6] : memref<2x4x16xf32, #tpu.memory_space<vmem>>, vector<2x4x16xf32>
    tpu.vector_store %arg6[%c0_4, %c0_5, %c0_6], %12 {strides = array<i32>} : memref<2x4x16xf32, #tpu.memory_space<vmem>>, vector<2x4x16xf32>,
    %c0_7 = arith.constant 0 : index
    %c0_8 = arith.constant 0 : index
    %c0_9 = arith.constant 0 : index
    %14 = vector.load %arg3[%c0_7, %c0_8, %c0_9] : memref<2x4x16xf32, #tpu.memory_space<vmem>>, vector<2x4x16xf32>
    %cst_10 = arith.constant 0.000000e+00 : f32
    %15 = vector.broadcast %cst_10 : f32 to vector<2x4x16xf32>
    %16 = arith.select %10, %14, %15 : vector<2x4x16xi1>, vector<2x4x16xf32>
    %c0_11 = arith.constant 0 : index
    %c0_12 = arith.constant 0 : index
    %c0_13 = arith.constant 0 : index
    %17 = vector.load %arg7[%c0_11, %c0_12, %c0_13] : memref<2x4x16xf32, #tpu.memory_space<vmem>>, vector<2x4x16xf32>
    tpu.vector_store %arg7[%c0_11, %c0_12, %c0_13], %16 {strides = array<i32>} : memref<2x4x16xf32, #tpu.memory_space<vmem>>, vector<2x4x16xf32>,
    %c0_i32_14 = arith.constant 0 : i32
    %c0_15 = arith.constant 0 : index
    %18 = arith.index_cast %c0_i32_14 : i32 to index
    %c0_16 = arith.constant 0 : index
    %19 = vector.load %arg7[%c0_15, %18, %c0_16] : memref<2x4x16xf32, #tpu.memory_space<vmem>>, vector<2x1x16xf32>
    %c0_17 = arith.constant 0 : index
    %20 = arith.index_cast %c0_i32_14 : i32 to index
    %c0_18 = arith.constant 0 : index
    %21 = vector.load %arg6[%c0_17, %20, %c0_18] : memref<2x4x16xf32, #tpu.memory_space<vmem>>, vector<2x1x16xf32>
    %22 = vector.broadcast %19 : vector<2x1x16xf32> to vector<2x4x16xf32>
    %23 = arith.mulf %22, %12 : vector<2x4x16xf32>
    %24 = arith.mulf %19, %21 : vector<2x1x16xf32>
    %25 = vector.broadcast %24 : vector<2x1x16xf32> to vector<2x4x16xf32>
    %26 = arith.subf %23, %25 : vector<2x4x16xf32>
    %cst_19 = arith.constant 0.000000e+00 : f32
    %27 = vector.broadcast %cst_19 : f32 to vector<2x4x16xf32>
    %28 = arith.maximumf %26, %27 : vector<2x4x16xf32>
    %c0_20 = arith.constant 0 : index
    %c0_21 = arith.constant 0 : index
    %29 = vector.load %arg5[%c0_20, %c0_21] : memref<2x16xf32, #tpu.memory_space<vmem>>, vector<2x16xf32>
    %cst_22 = arith.constant dense<0.000000e+00> : vector<2x16xf32>
    %30 = vector.multi_reduction <add>, %28, %cst_22 [1] : vector<2x4x16xf32> to vector<2x16xf32>
    %31 = arith.addf %29, %30 : vector<2x16xf32>
    %c0_23 = arith.constant 0 : index
    %c0_24 = arith.constant 0 : index
    %32 = vector.load %arg5[%c0_23, %c0_24] : memref<2x16xf32, #tpu.memory_space<vmem>>, vector<2x16xf32>
    tpu.vector_store %arg5[%c0_23, %c0_24], %31 {strides = array<i32>} : memref<2x16xf32, #tpu.memory_space<vmem>>, vector<2x16xf32>,
    %c1_i32_25 = arith.constant 1 : i32
    %c0_26 = arith.constant 0 : index
    %33 = arith.index_cast %c1_i32_25 : i32 to index
    %c0_27 = arith.constant 0 : index
    %34 = vector.load %arg7[%c0_26, %33, %c0_27] : memref<2x4x16xf32, #tpu.memory_space<vmem>>, vector<2x1x16xf32>
    %c0_28 = arith.constant 0 : index
    %35 = arith.index_cast %c1_i32_25 : i32 to index
    %c0_29 = arith.constant 0 : index
    %36 = vector.load %arg6[%c0_28, %35, %c0_29] : memref<2x4x16xf32, #tpu.memory_space<vmem>>, vector<2x1x16xf32>
    %37 = vector.broadcast %34 : vector<2x1x16xf32> to vector<2x4x16xf32>
    %38 = arith.mulf %37, %12 : vector<2x4x16xf32>
    %39 = arith.mulf %34, %36 : vector<2x1x16xf32>
    %40 = vector.broadcast %39 : vector<2x1x16xf32> to vector<2x4x16xf32>
    %41 = arith.subf %38, %40 : vector<2x4x16xf32>
    %cst_30 = arith.constant 0.000000e+00 : f32
    %42 = vector.broadcast %cst_30 : f32 to vector<2x4x16xf32>
    %43 = arith.maximumf %41, %42 : vector<2x4x16xf32>
    %c0_31 = arith.constant 0 : index
    %c0_32 = arith.constant 0 : index
    %44 = vector.load %arg5[%c0_31, %c0_32] : memref<2x16xf32, #tpu.memory_space<vmem>>, vector<2x16xf32>
    %cst_33 = arith.constant dense<0.000000e+00> : vector<2x16xf32>
    %45 = vector.multi_reduction <add>, %43, %cst_33 [1] : vector<2x4x16xf32> to vector<2x16xf32>
    %46 = arith.addf %44, %45 : vector<2x16xf32>
    %c0_34 = arith.constant 0 : index
    %c0_35 = arith.constant 0 : index
    %47 = vector.load %arg5[%c0_34, %c0_35] : memref<2x16xf32, #tpu.memory_space<vmem>>, vector<2x16xf32>
    tpu.vector_store %arg5[%c0_34, %c0_35], %46 {strides = array<i32>} : memref<2x16xf32, #tpu.memory_space<vmem>>, vector<2x16xf32>,
    %c2_i32_36 = arith.constant 2 : i32
    %c0_37 = arith.constant 0 : index
    %48 = arith.index_cast %c2_i32_36 : i32 to index
    %c0_38 = arith.constant 0 : index
    %49 = vector.load %arg7[%c0_37, %48, %c0_38] : memref<2x4x16xf32, #tpu.memory_space<vmem>>, vector<2x1x16xf32>
    %c0_39 = arith.constant 0 : index
    %50 = arith.index_cast %c2_i32_36 : i32 to index
    %c0_40 = arith.constant 0 : index
    %51 = vector.load %arg6[%c0_39, %50, %c0_40] : memref<2x4x16xf32, #tpu.memory_space<vmem>>, vector<2x1x16xf32>
    %52 = vector.broadcast %49 : vector<2x1x16xf32> to vector<2x4x16xf32>
    %53 = arith.mulf %52, %12 : vector<2x4x16xf32>
    %54 = arith.mulf %49, %51 : vector<2x1x16xf32>
    %55 = vector.broadcast %54 : vector<2x1x16xf32> to vector<2x4x16xf32>
    %56 = arith.subf %53, %55 : vector<2x4x16xf32>
    %cst_41 = arith.constant 0.000000e+00 : f32
    %57 = vector.broadcast %cst_41 : f32 to vector<2x4x16xf32>
    %58 = arith.maximumf %56, %57 : vector<2x4x16xf32>
    %c0_42 = arith.constant 0 : index
    %c0_43 = arith.constant 0 : index
    %59 = vector.load %arg5[%c0_42, %c0_43] : memref<2x16xf32, #tpu.memory_space<vmem>>, vector<2x16xf32>
    %cst_44 = arith.constant dense<0.000000e+00> : vector<2x16xf32>
    %60 = vector.multi_reduction <add>, %58, %cst_44 [1] : vector<2x4x16xf32> to vector<2x16xf32>
    %61 = arith.addf %59, %60 : vector<2x16xf32>
    %c0_45 = arith.constant 0 : index
    %c0_46 = arith.constant 0 : index
    %62 = vector.load %arg5[%c0_45, %c0_46] : memref<2x16xf32, #tpu.memory_space<vmem>>, vector<2x16xf32>
    tpu.vector_store %arg5[%c0_45, %c0_46], %61 {strides = array<i32>} : memref<2x16xf32, #tpu.memory_space<vmem>>, vector<2x16xf32>,
    %c3_i32 = arith.constant 3 : i32
    %c0_47 = arith.constant 0 : index
    %63 = arith.index_cast %c3_i32 : i32 to index
    %c0_48 = arith.constant 0 : index
    %64 = vector.load %arg7[%c0_47, %63, %c0_48] : memref<2x4x16xf32, #tpu.memory_space<vmem>>, vector<2x1x16xf32>
    %c0_49 = arith.constant 0 : index
    %65 = arith.index_cast %c3_i32 : i32 to index
    %c0_50 = arith.constant 0 : index
    %66 = vector.load %arg6[%c0_49, %65, %c0_50] : memref<2x4x16xf32, #tpu.memory_space<vmem>>, vector<2x1x16xf32>
    %67 = vector.broadcast %64 : vector<2x1x16xf32> to vector<2x4x16xf32>
    %68 = arith.mulf %67, %12 : vector<2x4x16xf32>
    %69 = arith.mulf %64, %66 : vector<2x1x16xf32>
    %70 = vector.broadcast %69 : vector<2x1x16xf32> to vector<2x4x16xf32>
    %71 = arith.subf %68, %70 : vector<2x4x16xf32>
    %cst_51 = arith.constant 0.000000e+00 : f32
    %72 = vector.broadcast %cst_51 : f32 to vector<2x4x16xf32>
    %73 = arith.maximumf %71, %72 : vector<2x4x16xf32>
    %c0_52 = arith.constant 0 : index
    %c0_53 = arith.constant 0 : index
    %74 = vector.load %arg5[%c0_52, %c0_53] : memref<2x16xf32, #tpu.memory_space<vmem>>, vector<2x16xf32>
    %cst_54 = arith.constant dense<0.000000e+00> : vector<2x16xf32>
    %75 = vector.multi_reduction <add>, %73, %cst_54 [1] : vector<2x4x16xf32> to vector<2x16xf32>
    %76 = arith.addf %74, %75 : vector<2x16xf32>
    %c0_55 = arith.constant 0 : index
    %c0_56 = arith.constant 0 : index
    %77 = vector.load %arg5[%c0_55, %c0_56] : memref<2x16xf32, #tpu.memory_space<vmem>>, vector<2x16xf32>
    tpu.vector_store %arg5[%c0_55, %c0_56], %76 {strides = array<i32>} : memref<2x16xf32, #tpu.memory_space<vmem>>, vector<2x16xf32>,
    %c4_i32 = arith.constant 4 : i32
    %c0_i32_57 = arith.constant 0 : i32
    %78 = arith.cmpi eq, %arg1, %c0_i32_57 : i32
    %79 = arith.extui %78 : i1 to i32
    %c0_i32_58 = arith.constant 0 : i32
    %80 = arith.cmpi ne, %79, %c0_i32_58 : i32
    scf.if %80 {
      %c0_59 = arith.constant 0 : index
      %c0_60 = arith.constant 0 : index
      %81 = vector.load %arg5[%c0_59, %c0_60] : memref<2x16xf32, #tpu.memory_space<vmem>>, vector<2x16xf32>
      %82 = vector.shape_cast %81 : vector<2x16xf32> to vector<1x2x16xf32>
      %cst_61 = arith.constant dense<0.000000e+00> : vector<1xf32>
      %83 = vector.multi_reduction <add>, %82, %cst_61 [1, 2] : vector<1x2x16xf32> to vector<1xf32>
      %84 = vector.shape_cast %83 : vector<1xf32> to vector<1x1x1xf32>
      %85 = vector.extract %84[0, 0, 0] : f32 from vector<1x1x1xf32>
      %86 = vector.broadcast %85 : f32 to vector<1x8x128xf32>
      %c0_62 = arith.constant 0 : index
      %c0_63 = arith.constant 0 : index
      %c0_64 = arith.constant 0 : index
      %87 = vector.load %arg4[%c0_62, %c0_63, %c0_64] : memref<1x8x128xf32, #tpu.memory_space<vmem>>, vector<1x8x128xf32>
      tpu.vector_store %arg4[%c0_62, %c0_63, %c0_64], %86 {strides = array<i32>} : memref<1x8x128xf32, #tpu.memory_space<vmem>>, vector<1x8x128xf32>,
    } else {
    }
    return
  }
  func.func @transform_0(%arg0: i32, %arg1: i32) -> (i32, i32, i32) {
    %c1_i32 = arith.constant 1 : i32
    %0 = arith.muli %arg0, %c1_i32 : i32
    %1 = arith.addi %0, %arg1 : i32
    %c0_i32 = arith.constant 0 : i32
    %2 = arith.minsi %1, %c0_i32 : i32
    %c0_i32_0 = arith.constant 0 : i32
    %c0_i32_1 = arith.constant 0 : i32
    %c0_i32_2 = arith.constant 0 : i32
    return %2, %c0_i32_0, %c0_i32_1 : i32, i32, i32
  }
  func.func @transform_1(%arg0: i32, %arg1: i32) -> (i32, i32, i32) {
    %c1_i32 = arith.constant 1 : i32
    %0 = arith.muli %arg0, %c1_i32 : i32
    %1 = arith.addi %0, %arg1 : i32
    %c0_i32 = arith.constant 0 : i32
    %2 = arith.minsi %1, %c0_i32 : i32
    %c0_i32_0 = arith.constant 0 : i32
    %c0_i32_1 = arith.constant 0 : i32
    %c0_i32_2 = arith.constant 0 : i32
    return %2, %c0_i32_0, %c0_i32_1 : i32, i32, i32
  }
  func.func @transform_2(%arg0: i32, %arg1: i32) -> (i32, i32, i32) {
    %c0_i32 = arith.constant 0 : i32
    %c0_i32_0 = arith.constant 0 : i32
    %c0_i32_1 = arith.constant 0 : i32
    return %arg0, %c0_i32, %c0_i32_0 : i32, i32, i32
  }
}

</mosaic_0001>

<bundles_post_ra>
// kernel: tpu_custom_call.1
= control target key start
LH: loop header
LB: loop body
LE: loop exit
PB: predicated region body
PF: predicated region fallthrough
CT: control target
= control target key end

     0   :  { %7 = vsyncpa [#allocation6], 0  ;;  %s1142_s0 = inlined_call_operand.hbm [shape: f32[2,4,16], index: 0, kind: input, shape index: {}]   ;;  %s1143_s1 = inlined_call_operand.hbm [shape: f32[2,4,16], index: 1, kind: input, shape index: {}]   ;;  %s1144_s2 = inlined_call_operand.hbm [shape: f32[2,8,128], index: 2, kind: output, shape index: {}]  }
   0x1   :  { %9 = vsyncpa [#allocation6 + $0x1], 0 }
   0x2   :  { %10 = vsyncpa [#allocation9], 0 }
   0x3   :  { %12 = vsyncpa [#allocation9 + $0x1], 0 }
   0x4   :  { %13 = vsyncpa [#allocation7], 0 }
   0x5   :  { %15 = vsyncpa [#allocation7 + $0x1], 0  ;;  %s895_s9 = smov 0   ;;  %s897_s10 = smov 0  }
   0x6   :  { %s899_s11 = smov 0   ;;  %s901_s12 = smov 0  }
   0x7   :  { %s903_s13 = smov 0   ;;  %s905_s14 = smov 0  }
   0x8   :  { %s907_s15 = smov 0   ;;  %s909_s16 = smov 0  }
   0x9 LB: > { %s594_s17 = sadd.s32 4294967295, %s872_s16   ;;  %s595_s18 = sadd.s32 4294967294, %s872_s16   ;;  %s872_s16 = sphi %s909_s16, %s21_s16   ;;  %s868_s15 = sphi %s907_s15, %s1165_s15   ;;  %s864_s14 = sphi %s905_s14, %s1164_s14   ;;  %s860_s13 = sphi %s903_s13, %s1132_s13   ;;  %s856_s12 = sphi %s901_s12, %s1163_s12   ;;  %s852_s11 = sphi %s899_s11, %s1162_s11   ;;  %s848_s10 = sphi %s897_s10, %s1161_s10   ;;  %s844_s9 = sphi %s895_s9, %s1160_s9  }
   0xa   : > { %s33_s19 = sadd.s32 1, %s868_s15  ;;  %p841_p1 = scmp.ne.s32.totalorder %s860_s13, 0 }
   0xb   : > { %p35_p0 = scmp.ge.s32.totalorder %s33_s19, 2  ;;  %p54_p2 = scmp.eq.s32.totalorder %s872_s16, 0 }
   0xc   : > { %p59_p3 = scmp.ne.s32.totalorder %s860_s13, %s856_s12  ;;  %p60_p5 = scmp.eq.s32.totalorder %s594_s17, 0 }
   0xd   : > { %s1167_s19 = smov (%p35_p0, %s33_s19), 0  ;;  %p941_p4 = por %p841_p1, %p54_p2 }
   0xe   : > { %p945_p6 = por %p60_p5, %p59_p3  ;;  %s101_s22 = ssub.s32 %s868_s15, %s1167_s19 }
   0xf   : > { %p102_p7 = scmp.eq.s32.totalorder %s101_s22, 0  ;;  %s104_s23 = sadd.s32 1, %s852_s11 }
  0x10   : > { %s1148_s21 = scalar_select %p945_p6, 1, 0 }
  0x11   : > { %s953_s24 = scalar_select %p102_p7, %s852_s11, %s104_s23  }
  0x12   : > { %p114_p8 = scmp.ne.s32.totalorder %s852_s11, %s848_s10  ;;  %p115_p9 = scmp.eq.s32.totalorder %s594_s17, 1 }
  0x13   : > { %p120_p10 = scmp.ne.s32.totalorder %s848_s10, %s844_s9  ;;  %p121_p11 = scmp.eq.s32.totalorder %s595_s18, 1 }
  0x14   : > { %p959_p12 = por %p115_p9, %p114_p8  ;;  %p634_p1 = scmp.lt.s32.totalorder %s872_s16, 2 }
  0x15   : > { %p964_p0 = por %p121_p11, %p120_p10  ;;  %s874_s27 = smov [#allocation5]  }
  0x16   : > { %s1149_s25 = scalar_select %p959_p12, 1, 0 }
  0x17   : > { %s1150_s26 = scalar_select %p964_p0, 1, 0 }
  0x18   : > { %s155_s28 = sshll.u32 %s874_s27, 4  ;;  %p971_p2 = pnand %p634_p1, %p941_p4  ;;  %s156_s28 = int_to_ptr.vmem [resolvable:$true] %s155_s28 }
  0x19   : > { %s711_s4 = scalar_lea.hbm %s1142_s0, 128 }
  0x1a   : > { %p712_p3 = scmp.ne.s32.totalorder %s1142_s0, %s711_s4  ;;  %p713_p5 = pneg %p971_p2 }
  0x1b   : > { %p718_p8 = scmp.lt.s32.totalorder %s711_s4, %s711_s4 }
  0x1c   : > { %p714_p7 = pnand %p713_p5, %p712_p3 }
  0x1e   : > { %p715_p4 = pneg %p714_p7 }
  0x20   : > { %p720_p9 = pnand %p718_p8, %p715_p4 }
  0x22   : > { %723 = shalt.err (!%p720_p9)
}
  0x23   : > { %s724_s7 = scalar_lea.vmem %s156_s28, 128  ;;  %s731_s8 = scalar_lea.vmem %s156_s28, 256 }
  0x24   : > { %p725_p10 = scmp.ne.s32.totalorder %s156_s28, %s724_s7  ;;  %p732_p13 = scmp.lt.s32.totalorder %s156_s28, %s156_s28 }
  0x25   : > { %p733_p0 = scmp.lt.s32.totalorder %s731_s8, %s724_s7 }
  0x26   : > { %p727_p11 = pnand %p725_p10, %p713_p5 }
  0x27   : > { %p734_p12 = por %p733_p0, %p732_p13 }
  0x28   : > { %p728_p1 = pneg %p727_p11 }
  0x2a   : > { %p735_p6 = pnand %p734_p12, %p728_p1 }
  0x2c   : > { %738 = shalt.err (!%p735_p6)
}
  0x2d   : > { %s875_s12 = smov 64   ;;  %s876_s17 = smov 4  }
  0x2e   : > { %626 = dma.hbm_to_vmem [thread:$0]  (!%p971_p2), %s1142_s0, 128, %s156_s28, [#allocation6], %s875_s12, %s875_s12, %s876_s17  }
  0x2f   : > { %p604_p3 = scmp.ge.s32.totalorder %s872_s16, 1  ;;  %p187_p7 = scmp.lt.s32.totalorder %s872_s16, 3 }
  0x30   : > { %s877_s23 = smov [#allocation8]   ;;  %s739_s4 = scalar_lea.hbm %s1143_s1, 128 }
  0x31   : > { %p996_p4 = pnand %p604_p3, %p187_p7  ;;  %s179_s27 = sshll.u32 %s877_s23, 4  ;;  %s180_s27 = int_to_ptr.vmem [resolvable:$true] %s179_s27 }
  0x32   : > { %p740_p6 = scmp.ne.s32.totalorder %s1143_s1, %s739_s4  ;;  %p746_p0 = scmp.lt.s32.totalorder %s739_s4, %s739_s4 }
  0x33   : > { %s1152_s22 = scalar_select %p996_p4, 1, 0 }
  0x34   : > { %p742_p12 = pnand %p740_p6, %p713_p5 }
  0x36   : > { %p743_p13 = pneg %p742_p12 }
  0x38   : > { %p748_p8 = pnand %p746_p0, %p743_p13 }
  0x3a   : > { %751 = shalt.err (!%p748_p8)
}
  0x3b   : > { %s752_s28 = scalar_lea.vmem %s180_s27, 128  ;;  %s759_s7 = scalar_lea.vmem %s180_s27, 256 }
  0x3c   : > { %p753_p9 = scmp.ne.s32.totalorder %s180_s27, %s752_s28  ;;  %p760_p1 = scmp.lt.s32.totalorder %s180_s27, %s180_s27 }
  0x3d   : > { %p761_p3 = scmp.lt.s32.totalorder %s759_s7, %s752_s28 }
  0x3e   : > { %p755_p10 = pnand %p753_p9, %p713_p5 }
  0x3f   : > { %p762_p7 = por %p761_p3, %p760_p1 }
  0x40   : > { %p756_p11 = pneg %p755_p10 }
  0x42   : > { %p763_p4 = pnand %p762_p7, %p756_p11 }
  0x44   : > { %766 = shalt.err (!%p763_p4)
}
  0x45   : > { %629 = dma.hbm_to_vmem [thread:$0]  (!%p971_p2), %s1143_s1, 128, %s180_s27, [#allocation9], %s875_s12, %s875_s12, %s876_s17  }
  0x46   : > { %p1153_p6 = scmp.ne.s32.totalorder %s1152_s22, 0 }
  0x47   : > { %s193_s20 = sand.u32 (!%p1153_p6), 1, %s860_s13   ;;  %p1154_p5 = scmp.ne.s32.totalorder (!%p1153_p6), %s1148_s21, 0 }
  0x48   : > { %191 = sbr.rel (%p1153_p6) target bundleno = 372 (0x174), region = 28  ;;  %s605_s23 = sshll.u32 (!%p1153_p6), %s193_s20, 3 }
  0x49   : > { %s194_s30 = scalar_lea.sflag (!%p1153_p6), [#allocation6], %s193_s20  ;;  %s197_s3 = scalar_lea.vmem (!%p1153_p6), [#allocation5], %s605_s23 }
  0x4d   : > { %830 = dma.done.wait (%p1154_p5), %s194_s30, 128  }
  0x4e   : > { %832 = vsyncadd (%p1154_p5), %s194_s30, 4294967168  ;;  %s203_s29 = scalar_lea.sflag [#allocation9], %s193_s20  ;;  %s206_s4 = scalar_lea.vmem [#allocation8], %s605_s23 }
  0x4f   : > { %834 = dma.done.wait (%p1154_p5), %s203_s29, 128  }
  0x50   : > { %836 = vsyncadd (%p1154_p5), %s203_s29, 4294967168  ;;  %vm244_vm0 = vcmask 123904   ;;  %s608_s12 = sshll.u32 %s864_s14, 1  ;;  %v878_v0 = vmov 0.0   ;;  %v269_v3 = vlaneseq  ;;  %vm256_vm3 = vcmask 125952   ;;  %s229_s21 = sand.u32 1, %s848_s10  }
  0x51   : > { %245 = vst.msk [vmem:[#allocation2] sm:$0x3] %vm244_vm0, %v878_v0  ;;  %s250_s17 = ssub.s32 2, %s608_s12  ;;  %v246_v4 = vld [vmem:[%s197_s3] sm:$0xf]  ;;  %vm310_vm4 = vcmask 1041409  }
  0x52   : > { %v251_v1 = vstv %s250_s17  ;;  %v247_v5 = vld [vmem:[%s197_s3 + $0x4] sm:$0xf]  ;;  %v259_v6 = vld [vmem:[%s206_s4] sm:$0xf]  ;;  %v260_v9 = vld [vmem:[%s206_s4 + $0x4] sm:$0xf] }
  0x53   : > { %vm252_vm1 = vcmp.gt.s32.totalorder %v251_v1, 0  ;;  %vm1030_vm2 = vcmp.gt.s32.totalorder %v251_v1, 1  ;;  %v270_v12 = vshrl.u32 %v269_v3, 7  ;;  %s607_s22 = sshll.u32 %s229_s21, 3  ;;  %s610_s6 = sshll.u32 %s864_s14, 7 }
  0x54   : > { %v1034_v7 = vsel %vm252_vm1, %v246_v4, 0.0  ;;  %v1038_v8 = vsel %vm1030_vm2, %v247_v5, 0.0  ;;  %v261_v10 = vsel %vm252_vm1, %v259_v6, 0.0  ;;  %v262_v11 = vsel %vm1030_vm2, %v260_v9, 0.0  ;;  %s231_s27 = scalar_lea.vmem [#allocation10], %s607_s22  ;;  %s491_s18 = scalar_lea.hbm %s1144_s2, %s610_s6 }
  0x55   : > { %257 = vst.msk [vmem:[#allocation3] sm:$0xf] %vm256_vm3, %v1034_v7  ;;  %258 = vst.msk [vmem:[#allocation3 + $0x4] sm:$0xf] %vm256_vm3, %v1038_v8  ;;  %v1048_v13 = vsub.s32 0, %v270_v12  ;;  %s493_s5 = sshll.u32 %s231_s27, 4  ;;  %s1093_s5 = int_to_ptr.vmem [resolvable:$true] %s493_s5 }
  0x56   : > { %263 = vst.msk [vmem:[#allocation4] sm:$0xf] %vm256_vm3, %v261_v10  ;;  %264 = vst.msk [vmem:[#allocation4 + $0x4] sm:$0xf] %vm256_vm3, %v262_v11  ;;  %s480_s20 = scalar_lea.sflag [#allocation7], %s229_s21  ;;  %s767_s23 = scalar_lea.vmem %s1093_s5, 128 }
  0x57   : > { %p768_p2 = scmp.ne.s32.totalorder %s1093_s5, %s767_s23  ;;  %p1157_p4 = scmp.ne.s32.totalorder %s1149_s25, 0 }
  0x58   : > { %s879_s30 = smov [#allocation10]  }
  0x59   : > { %p769_p12 = pnand %p768_p2, %p1157_p4  ;;  %s771_s14 = sshll.u32 %s879_s30, 4  ;;  %s772_s14 = int_to_ptr.vmem [resolvable:$false] %s771_s14 }
  0x5a   : > { %s773_s3 = scalar_lea.vmem %s772_s14, 256  ;;  %p774_p0 = scmp.lt.s32.totalorder %s1093_s5, %s772_s14 }
  0x5b   : > { %p770_p13 = pneg %p769_p12  ;;  %p775_p8 = scmp.lt.s32.totalorder %s773_s3, %s767_s23 }
  0x5c   : > { %v267_v15 = vld [vmem:[#allocation3] sm:$0x1]  ;;  %v268_v16 = vld [vmem:[#allocation3 + $0x4] sm:$0x1]  ;;  %v318_v24 = vld [vmem:[#allocation3 + $0x1] sm:$0x1] }
  0x5d   : > { %v265_v14 = vld [vmem:[#allocation4] sm:$0x1]  ;;  %v266_v17 = vld [vmem:[#allocation4 + $0x4] sm:$0x1]  ;;  %v316_v20 = vld [vmem:[#allocation4 + $0x1] sm:$0x1]  ;;  %p776_p9 = por %p775_p8, %p774_p0 }
  0x5e   : > { %v272_v18 = vrot.slane %v265_v14, %v1048_v13  ;;  %v279_v19 = vmul.f32 %v267_v15, %v265_v14  ;;  %v317_v21 = vld [vmem:[#allocation4 + $0x5] sm:$0x1]  ;;  %v276_v22 = vrot.slane %v266_v17, %v1048_v13  ;;  %v280_v23 = vmul.f32 %v268_v16, %v266_v17  ;;  %v319_v25 = vld [vmem:[#allocation3 + $0x5] sm:$0x1]  ;;  %v365_v28 = vld [vmem:[#allocation4 + $0x2] sm:$0x1] }
  0x5f   : > { %v323_v26 = vrot.slane %v316_v20, %v1048_v13  ;;  %v327_v27 = vrot.slane %v317_v21, %v1048_v13  ;;  %v330_v31 = vmul.f32 %v318_v24, %v316_v20  ;;  %v331_v32 = vmul.f32 %v319_v25, %v317_v21  ;;  %v366_v33 = vld [vmem:[#allocation4 + $0x6] sm:$0x1]  ;;  %v367_v34 = vld [vmem:[#allocation3 + $0x2] sm:$0x1]  ;;  %v368_v35 = vld [vmem:[#allocation3 + $0x6] sm:$0x1]  ;;  %p777_p10 = pnand %p776_p9, %p770_p13 }
  0x60   : > { %v277_v29 = vmul.f32 %v272_v18, %v1034_v7  ;;  %v284_v30 = vrot.slane %v279_v19, %v1048_v13  ;;  %v278_v36 = vmul.f32 %v276_v22, %v1038_v8  ;;  %v288_v37 = vrot.slane %v280_v23, %v1048_v13  ;;  %v414_v48 = vld [vmem:[#allocation4 + $0x3] sm:$0x1]  ;;  %v415_v57 = vld [vmem:[#allocation4 + $0x7] sm:$0x1]  ;;  %v416_v12 = vld [vmem:[#allocation3 + $0x3] sm:$0x1] }
  0x61   : > { %v328_v38 = vmul.f32 %v323_v26, %v1034_v7  ;;  %v329_v39 = vmul.f32 %v327_v27, %v1038_v8  ;;  %v335_v41 = vrot.slane %v330_v31, %v1048_v13  ;;  %v339_v42 = vrot.slane %v331_v32, %v1048_v13  ;;  %v417_v21 = vld [vmem:[#allocation3 + $0x7] sm:$0x1] }
  0x62   : > { %v289_v40 = vsub.f32 %v277_v29, %v284_v30  ;;  %v372_v43 = vrot.slane %v365_v28, %v1048_v13  ;;  %v290_v44 = vsub.f32 %v278_v36, %v288_v37  ;;  %v376_v45 = vrot.slane %v366_v33, %v1048_v13 }
  0x63   : > { %v379_v46 = vmul.f32 %v367_v34, %v365_v28  ;;  %v380_v47 = vmul.f32 %v368_v35, %v366_v33  ;;  %v340_v50 = vsub.f32 %v328_v38, %v335_v41  ;;  %v341_v51 = vsub.f32 %v329_v39, %v339_v42 }
  0x64   : > { %v291_v49 = vmax.f32 %v289_v40, 0.0  ;;  %v377_v52 = vmul.f32 %v372_v43, %v1034_v7  ;;  %v292_v53 = vmax.f32 %v290_v44, 0.0  ;;  %v378_v54 = vmul.f32 %v376_v45, %v1038_v8  ;;  %v293_v40 = vld [vmem:[#allocation2] sm:$0x3] }
  0x65   : > { %v384_v55 = vrot.slane %v379_v46, %v1048_v13  ;;  %v388_v56 = vrot.slane %v380_v47, %v1048_v13  ;;  %v342_v59 = vmax.f32 %v340_v50, 0.0  ;;  %v343_v60 = vmax.f32 %v341_v51, 0.0 }
  0x66   : > { %v294_v58 = vsel %vm256_vm3, %v291_v49, 0.0  ;;  %v421_v61 = vrot.slane %v414_v48, %v1048_v13  ;;  %v301_v63 = vsel %vm256_vm3, %v292_v53, 0.0  ;;  %v425_v5 = vrot.slane %v415_v57, %v1048_v13 }
  0x67   : > { %v295_v62 = vrot.slane %v294_v58, 4  ;;  %v389_v0 = vsub.f32 %v377_v52, %v384_v55  ;;  %v390_v1 = vsub.f32 %v378_v54, %v388_v56  ;;  %v302_v2 = vrot.slane %v301_v63, 4 }
  0x68   : > { %v345_v3 = vsel %vm256_vm3, %v342_v59, 0.0  ;;  %v352_v4 = vsel %vm256_vm3, %v343_v60, 0.0  ;;  %v426_v16 = vmul.f32 %v421_v61, %v1034_v7  ;;  %v427_v24 = vmul.f32 %v425_v5, %v1038_v8 }
  0x69   : > { %v296_v6 = vadd.f32 %v295_v62, %v294_v58  ;;  %v346_v9 = vrot.slane %v345_v3, 4  ;;  %v353_v10 = vrot.slane %v352_v4, 4  ;;  %v391_v11 = vmax.f32 %v389_v0, 0.0 }
  0x6a   : > { %v303_v14 = vadd.f32 %v302_v2, %v301_v63  ;;  %v392_v15 = vmax.f32 %v390_v1, 0.0  ;;  %v428_v25 = vmul.f32 %v416_v12, %v414_v48  ;;  %v429_v32 = vmul.f32 %v417_v21, %v415_v57 }
  0x6b   : > { %v297_v17 = vrot.slane %v296_v6, 2  ;;  %v347_v18 = vadd.f32 %v346_v9, %v345_v3  ;;  %v354_v19 = vadd.f32 %v353_v10, %v352_v4  ;;  %v394_v20 = vsel %vm256_vm3, %v391_v11, 0.0 }
  0x6c   : > { %v304_v22 = vrot.slane %v303_v14, 2  ;;  %v401_v23 = vsel %vm256_vm3, %v392_v15, 0.0  ;;  %v395_v29 = vrot.slane %v394_v20, 4  ;;  %v433_v7 = vrot.slane %v428_v25, %v1048_v13 }
  0x6d   : > { %v298_v26 = vadd.f32 %v297_v17, %v296_v6  ;;  %v348_v27 = vrot.slane %v347_v18, 2  ;;  %v355_v28 = vrot.slane %v354_v19, 2  ;;  %v402_v31 = vrot.slane %v401_v23, 4 }
  0x6e   : > { %v305_v30 = vadd.f32 %v304_v22, %v303_v14  ;;  %v437_v37 = vrot.slane %v429_v32, %v1048_v13  ;;  %v438_v38 = vsub.f32 %v426_v16, %v433_v7  ;;  %v396_v8 = vadd.f32 %v395_v29, %v394_v20 }
  0x6f   : > { %v299_v33 = vrot.slane %v298_v26, 1  ;;  %v349_v34 = vadd.f32 %v348_v27, %v347_v18  ;;  %v356_v36 = vadd.f32 %v355_v28, %v354_v19  ;;  %v403_v42 = vadd.f32 %v402_v31, %v401_v23 }
  0x70   : > { %v306_v35 = vrot.slane %v305_v30, 1  ;;  %v439_v43 = vsub.f32 %v427_v24, %v437_v37  ;;  %v440_v44 = vmax.f32 %v438_v38, 0.0  ;;  %v397_v51 = vrot.slane %v396_v8, 2 }
  0x71   : > { %v300_v39 = vadd.f32 %v299_v33, %v298_v26  ;;  %v350_v46 = vrot.slane %v349_v34, 1  ;;  %v357_v47 = vrot.slane %v356_v36, 1  ;;  %v404_v52 = vrot.slane %v403_v42, 2 }
  0x72   : > { %v307_v41 = vadd.f32 %v306_v35, %v305_v30  ;;  %v441_v48 = vmax.f32 %v439_v43, 0.0  ;;  %v443_v50 = vsel %vm256_vm3, %v440_v44, 0.0  ;;  %v398_v57 = vadd.f32 %v397_v51, %v396_v8 }
  0x73   : > { %v351_v53 = vadd.f32 %v350_v46, %v349_v34  ;;  %v358_v54 = vadd.f32 %v357_v47, %v356_v36  ;;  %v444_v55 = vrot.slane %v443_v50, 4  ;;  %v405_v58 = vadd.f32 %v404_v52, %v403_v42 }
  0x74   : > { %v311_v45 = vsel %vm310_vm4, %v307_v41, %v300_v39  ;;  %v450_v13 = vsel %vm256_vm3, %v441_v48, 0.0  ;;  %v399_v63 = vrot.slane %v398_v57, 1 }
  0x75   : > { %v313_v49 = vadd.f32 %v311_v45, %v293_v40  ;;  %v451_v56 = vrot.slane %v450_v13, 4  ;;  %v361_v59 = vsel %vm310_vm4, %v358_v54, %v351_v53  ;;  %v445_v60 = vadd.f32 %v444_v55, %v443_v50 }
  0x76   : > { %v406_v0 = vrot.slane %v405_v58, 1  ;;  %v400_v4 = vadd.f32 %v399_v63, %v398_v57 }
  0x77   : > { %315 = vst.msk [vmem:[#allocation2] sm:$0x3] %vm244_vm0, %v313_v49  ;;  %v452_v61 = vadd.f32 %v451_v56, %v450_v13  ;;  %v446_v2 = vrot.slane %v445_v60, 2 }
  0x78   : > { %v407_v5 = vadd.f32 %v406_v0, %v405_v58 }
  0x79   : > { %v453_v3 = vrot.slane %v452_v61, 2  ;;  %v447_v6 = vadd.f32 %v446_v2, %v445_v60 }
  0x7a   : > { %v410_v10 = vsel %vm310_vm4, %v407_v5, %v400_v4 }
  0x7b   : > { %v454_v9 = vadd.f32 %v453_v3, %v452_v61  ;;  %v448_v12 = vrot.slane %v447_v6, 1 }
  0x7d   : > { %v455_v14 = vrot.slane %v454_v9, 1  ;;  %v449_v16 = vadd.f32 %v448_v12, %v447_v6 }
  0x7e   : > { %v344_v62 = vld [vmem:[#allocation2] sm:$0x3] }
  0x7f   : > { %v363_v1 = vadd.f32 %v361_v59, %v344_v62  ;;  %v456_v17 = vadd.f32 %v455_v14, %v454_v9 }
  0x81   : > { %364 = vst.msk [vmem:[#allocation2] sm:$0x3] %vm244_vm0, %v363_v1  ;;  %v459_v18 = vsel %vm310_vm4, %v456_v17, %v449_v16 }
  0x88   : > { %v393_v11 = vld [vmem:[#allocation2] sm:$0x3] }
  0x89   : > { %v412_v15 = vadd.f32 %v410_v10, %v393_v11 }
  0x8b   : > { %413 = vst.msk [vmem:[#allocation2] sm:$0x3] %vm244_vm0, %v412_v15 }
  0x92   : > { %v442_v19 = vld [vmem:[#allocation2] sm:$0x3] }
  0x93   : > { %v461_v20 = vadd.f32 %v459_v18, %v442_v19 }
  0x95   : > { %462 = vst.msk [vmem:[#allocation2] sm:$0x3] %vm244_vm0, %v461_v20 }
  0x9c   : > { %v466_v21 = vld [vmem:[#allocation2] sm:$0x3] }
  0x9d   : > { %v467_v22 = vsel %vm244_vm0, %v466_v21, 0.0 }
  0x9e   : > { %468 = vadd.xlane.f32.xlu0 %v467_v22 }
 0x127   : > { %v469_v23 = vpop.xlane.xlu0 %468 }
 0x128   : > { %v470_v24 = vrot.slane %v469_v23, 4 }
 0x12a   : > { %v471_v25 = vadd.f32 %v470_v24, %v469_v23 }
 0x12c   : > { %v472_v26 = vrot.slane %v471_v25, 2 }
 0x12e   : > { %v473_v27 = vadd.f32 %v472_v26, %v471_v25 }
 0x130   : > { %v474_v28 = vrot.slane %v473_v27, 1 }
 0x132   : > { %v475_v29 = vadd.f32 %v474_v28, %v473_v27 }
 0x134   : > { %615 = vpush %v475_v29 }
 0x165   : > { %s616_s28 = spop %615 }
 0x166   : > { %v477_v30 = vstv %s616_s28 }
 0x167   : > { %478 = vst [vmem:[%s231_s27] sm:$0xff] %v477_v30 }
 0x168   : > { %780 = shalt.err (!%p777_p10)
}
 0x169   : > { %s781_s29 = scalar_lea.hbm %s491_s18, 128  ;;  %s785_s17 = scalar_lea.hbm %s1144_s2, 256 }
 0x16a   : > { %p782_p11 = scmp.ne.s32.totalorder %s491_s18, %s781_s29  ;;  %p786_p7 = scmp.lt.s32.totalorder %s491_s18, %s1144_s2 }
 0x16b   : > { %p787_p6 = scmp.lt.s32.totalorder %s785_s17, %s781_s29 }
 0x16c   : > { %p783_p1 = pnand %p782_p11, %p1157_p4 }
 0x16d   : > { %p788_p5 = por %p787_p6, %p786_p7 }
 0x16e   : > { %p784_p3 = pneg %p783_p1 }
 0x170   : > { %p789_p2 = pnand %p788_p5, %p784_p3 }
 0x172   : > { %792 = shalt.err (!%p789_p2)
}
 0x173   : > { %621 = dma.vmem_to_hbm [thread:$0]  (%p1157_p4), %s1093_s5, 128, %s491_s18, %s480_s20  }
 0x174 PF: > { %s505_s27 = sand.u32 1, %s844_s9   ;;  %p1158_p12 = scmp.ne.s32.totalorder %s1150_s26, 0 }
 0x175   : > { %p1159_p13 = scmp.ge.s32.totalorder %s872_s16, 2  ;;  %s506_s6 = scalar_lea.sflag [#allocation7], %s505_s27 }
 0x177   : > { %p631_p0 = pnand %p1159_p13, %p1158_p12 }
 0x179   : > { %p632_p8 = pneg %p631_p0 }
 0x17b   : > { %838 = dma.done.wait (%p632_p8), %s506_s6, 128  }
 0x17c   : > { %840 = vsyncadd (%p632_p8), %s506_s6, 4294967168  ;;  %s21_s16 = sadd.s32 1, %s872_s16   ;;  %s1160_s9 = smov %s848_s10 }
 0x17d   : > { %p18_p9 = scmp.ge.s32.totalorder %s21_s16, 4   ;;  %s1161_s10 = smov %s852_s11 }
 0x17e   : > { %s1162_s11 = smov %s953_s24  ;;  %s1163_s12 = smov %s860_s13 }
 0x17f   : > { %s1132_s13 = smov 0   ;;  %s1164_s14 = smov %s868_s15 }
 0x180   : > { %s1165_s15 = smov %s1167_s19  ;;  %20 = sbr.rel (!%p18_p9) target bundleno = 9 (0x9), region = 94 }
 0x185   :  { %511 = vsyncpa [#allocation6], 1 }
 0x186   :  { %513 = vsyncpa [#allocation6 + $0x1], 1 }
 0x187   :  { %514 = vsyncpa [#allocation9], 1 }
 0x188   :  { %516 = vsyncpa [#allocation9 + $0x1], 1 }
 0x189   :  { %517 = vsyncpa [#allocation7], 1 }
 0x18a   :  { %519 = vsyncpa [#allocation7 + $0x1], 1 }

</bundles_post_ra>
